<compile_context>
chip_gen: v7x
topology: tpu7x:2x2x1
jax: 0.10.0
libtpu: 0.0.40
codegen_flags: <defaults>
</compile_context>

<pallas_src>
import functools

import jax
import jax.numpy as jnp
from jax.experimental import pallas as pl
from jax.experimental.pallas import tpu as pltpu


def _round_up(x, m):
    return (x + m - 1) // m * m


# ----------------------------------------------------------------------------
# Fused encoder + cross-attention decoder kernel (single invocation, no grid).
#   enc    = tanh(src_emb @ W_enc + b_enc)                      [B*S, H]
#   q      = tgt_emb @ Wq ; k = enc @ Wk ; v = enc @ Wv
#   attn_b = softmax(q_b k_b^T / sqrt(H)) ; ctx_b = attn_b @ v_b   (per batch b)
#   h      = tanh(ctx + tgt_emb)
#   logits = h @ Wo + bo                                        [B*T, Vpad]
# ----------------------------------------------------------------------------
def _seq2seq_fused_kernel(src_ref, tgt_ref, wenc_ref, benc_ref,
                          wq_ref, wk_ref, wv_ref, wo_ref, bo_ref,
                          out_ref, ctx_ref, *,
                          batch, src_len, tgt_len, hidden):
    f32 = jnp.float32
    cdt = wenc_ref.dtype            # bf16: MXU-native operand dtype

    # ---------------- encoder: enc = tanh(src @ W_enc + b_enc) --------------
    src = src_ref[...]                                              # [B*S, H] bf16
    enc_f32 = jnp.tanh(
        jnp.dot(src, wenc_ref[...], preferred_element_type=f32)
        + benc_ref[...])                                            # f32 elementwise
    enc = enc_f32.astype(cdt)

    # ---------------- decoder projections (batch folded into M) -------------
    tgt = tgt_ref[...]                                              # [B*T, H] bf16
    q = jnp.dot(tgt, wq_ref[...], preferred_element_type=f32)       # [B*T, H]
    k = jnp.dot(enc, wk_ref[...], preferred_element_type=f32)       # [B*S, H]
    v = jnp.dot(enc, wv_ref[...], preferred_element_type=f32).astype(cdt)

    scale = 1.0 / (hidden ** 0.5)
    # contract the shared last (H) dim of q and k directly: no k.T relayout
    dn = (((1,), (1,)), ((), ()))

    # ---------------- per-batch cross attention (B static -> unrolled) ------
    for b in range(batch):
        qb = q[b * tgt_len:(b + 1) * tgt_len, :].astype(cdt)        # [T, H]
        kb = k[b * src_len:(b + 1) * src_len, :].astype(cdt)        # [S, H]
        vb = v[b * src_len:(b + 1) * src_len, :]                    # [S, H]

        scores = jax.lax.dot_general(
            qb, kb, dn, preferred_element_type=f32) * scale          # [T, S]
        m = scores.max(axis=-1, keepdims=True)
        p = jnp.exp(scores - m)
        denom = p.sum(axis=-1, keepdims=True)
        attn = (p * pl.reciprocal(denom, approx=True)).astype(cdt)   # EUP vrcp

        ctx_ref[pl.ds(b * tgt_len, tgt_len), :] = jnp.dot(
            attn, vb, preferred_element_type=f32)                    # [T, H]

    # ---------------- residual + vocab projection (lane-dense Vpad) ---------
    h = jnp.tanh(ctx_ref[...] + tgt.astype(f32)).astype(cdt)         # [B*T, H]
    logits = jnp.dot(h, wo_ref[...], preferred_element_type=f32) + bo_ref[...]
    out_ref[...] = logits                                            # [B*T, Vpad]


def seq2seq_forward(src_emb2d, tgt_emb2d, w_enc, b_enc, wq, wk, wv,
                    wo_pad, bo_pad, *, batch, src_len, tgt_len, hidden):
    bt = batch * tgt_len
    v_pad = wo_pad.shape[1]
    kernel = functools.partial(
        _seq2seq_fused_kernel,
        batch=batch, src_len=src_len, tgt_len=tgt_len, hidden=hidden)
    # Whole problem (<100 KB) is VMEM resident: no grid, full-array blocks,
    # encoder_out kept in a VMEM scratch buffer.
    return pl.pallas_call(
        kernel,
        out_shape=jax.ShapeDtypeStruct((bt, v_pad), jnp.float32),
        scratch_shapes=[pltpu.VMEM((bt, hidden), jnp.float32)],
    )(src_emb2d, tgt_emb2d, w_enc, b_enc, wq, wk, wv, wo_pad, bo_pad)


# ----------------------------------------------------------------------------
# NSeq2SeqModel equivalent
# ----------------------------------------------------------------------------
class NSeq2SeqModelPallas:
    """forward(input_seq, target_seq) = decoder(target_seq, encoder(input_seq))."""

    LANE = 128

    def __init__(self, vocab_size=64, hidden=32, seed=0):
        self._vocab_size = vocab_size
        self._hidden = hidden
        self._teacher_forcing_ratio = 0.5   # train-time sampling knob, unused in forward
        # TODO(synk): `infer()` (greedy incremental decode loop with topk) is a
        # host-side Python loop, not part of forward; not implemented as a kernel.

        H, V = hidden, vocab_size
        Vp = _round_up(V, self.LANE)        # pad vocab so logits stores are lane-dense
        self._vocab_pad = Vp

        keys = jax.random.split(jax.random.PRNGKey(seed), 8)
        s = 0.02
        bf16, f32 = jnp.bfloat16, jnp.float32
        # Weights/embeddings in bf16 (MXU-native on v6e/v7x, halves DMA bytes);
        # biases in f32 (added after the f32 MXU accumulation).
        self.src_embed = (s * jax.random.normal(keys[0], (V, H))).astype(bf16)
        self.tgt_embed = (s * jax.random.normal(keys[1], (V, H))).astype(bf16)
        self.w_enc = (s * jax.random.normal(keys[2], (H, H))).astype(bf16)
        self.b_enc = jnp.zeros((1, H), f32)
        self.wq = (s * jax.random.normal(keys[3], (H, H))).astype(bf16)
        self.wk = (s * jax.random.normal(keys[4], (H, H))).astype(bf16)
        self.wv = (s * jax.random.normal(keys[5], (H, H))).astype(bf16)
        wo = (s * jax.random.normal(keys[6], (H, V))).astype(bf16)
        bo = jnp.zeros((1, V), f32)
        # Zero-pad the vocab axis to a multiple of 128; padded logit columns are
        # exactly zero and are sliced off in the wrapper (math unchanged).
        self.wo = jnp.pad(wo, ((0, 0), (0, Vp - V)))
        self.bo = jnp.pad(bo, ((0, 0), (0, Vp - V)))

        n_params = sum(int(p.size) for p in (
            self.src_embed, self.tgt_embed, self.w_enc, self.b_enc,
            self.wq, self.wk, self.wv)) + int(wo.size) + int(bo.size)
        print('num of param: {}'.format(n_params))
        print('VOCAB is {}'.format(self._vocab_size))

    def forward(self, input_seq, target_seq, incremental=None):
        H, V = self._hidden, self._vocab_size
        B, S = input_seq.shape
        _, T = target_seq.shape

        # Embedding gathers stay in plain JAX (glue).
        # TODO(synk): could be pulled into the kernel via PrefetchScalarGridSpec
        # + pl.Element row gather if the HBM round trip ever matters.
        src_emb = jnp.take(self.src_embed, input_seq, axis=0).reshape(B * S, H)
        tgt_emb = jnp.take(self.tgt_embed, target_seq, axis=0).reshape(B * T, H)

        logits_pad = seq2seq_forward(
            src_emb, tgt_emb, self.w_enc, self.b_enc,
            self.wq, self.wk, self.wv, self.wo, self.bo,
            batch=B, src_len=S, tgt_len=T, hidden=H)                 # [B*T, Vpad]

        return logits_pad[:, :V].reshape(B, T, V)                    # [B, T, V] f32

    __call__ = forward


if __name__ == "__main__":
    B, S, T, H, V = 2, 16, 8, 32, 64

    model = NSeq2SeqModelPallas(vocab_size=V, hidden=H, seed=0)

    key = jax.random.PRNGKey(0)
    k_src, k_tgt = jax.random.split(key)
    input_seq = jax.random.randint(k_src, (B, S), 0, V, dtype=jnp.int32)
    target_seq = jax.random.randint(k_tgt, (B, T), 0, V, dtype=jnp.int32)

    outs = model(input_seq, target_seq)
    outs = jax.block_until_ready(outs)

    assert outs.shape == (B, T, V), outs.shape
    assert outs.dtype == jnp.float32
    assert bool(jnp.all(jnp.isfinite(outs)))
    print("KERNEL_OK")
</pallas_src>

<mosaic_0001>
module attributes {stable_mosaic.version = 11 : i64} {
  func.func @_seq2seq_fused_kernel(%arg0: memref<32x32xbf16, #tpu.memory_space<vmem>>, %arg1: memref<16x32xbf16, #tpu.memory_space<vmem>>, %arg2: memref<32x32xbf16, #tpu.memory_space<vmem>>, %arg3: memref<1x32xf32, #tpu.memory_space<vmem>>, %arg4: memref<32x32xbf16, #tpu.memory_space<vmem>>, %arg5: memref<32x32xbf16, #tpu.memory_space<vmem>>, %arg6: memref<32x32xbf16, #tpu.memory_space<vmem>>, %arg7: memref<32x128xbf16, #tpu.memory_space<vmem>>, %arg8: memref<1x128xf32, #tpu.memory_space<vmem>>, %arg9: memref<16x128xf32, #tpu.memory_space<vmem>>, %arg10: memref<16x32xf32, #tpu.memory_space<vmem>>) attributes {dimension_semantics = [], scalar_prefetch = 0 : i64, scratch_operands = 1 : i64, tpu.core_type = #tpu.core_type<tc>} {
    %c0 = arith.constant 0 : index
    %c0_0 = arith.constant 0 : index
    %0 = vector.load %arg0[%c0, %c0_0] : memref<32x32xbf16, #tpu.memory_space<vmem>>, vector<32x32xbf16>
    %c0_1 = arith.constant 0 : index
    %c0_2 = arith.constant 0 : index
    %1 = vector.load %arg2[%c0_1, %c0_2] : memref<32x32xbf16, #tpu.memory_space<vmem>>, vector<32x32xbf16>
    %cst = arith.constant dense<0.000000e+00> : vector<32x32xf32>
    %2 = tpu.matmul %0, %1, %cst {dimension_numbers = #tpu.dot_dimension_numbers<[1], [0], [0], [1], [0, 0, 1, 1], [], []>} : vector<32x32xbf16>, vector<32x32xbf16>, vector<32x32xf32> -> vector<32x32xf32>
    %c0_3 = arith.constant 0 : index
    %c0_4 = arith.constant 0 : index
    %3 = vector.load %arg3[%c0_3, %c0_4] : memref<1x32xf32, #tpu.memory_space<vmem>>, vector<1x32xf32>
    %4 = vector.broadcast %3 : vector<1x32xf32> to vector<32x32xf32>
    %5 = arith.addf %2, %4 : vector<32x32xf32>
    %6 = math.tanh %5 : vector<32x32xf32>
    %7 = arith.truncf %6 : vector<32x32xf32> to vector<32x32xbf16>
    %c0_5 = arith.constant 0 : index
    %c0_6 = arith.constant 0 : index
    %8 = vector.load %arg1[%c0_5, %c0_6] : memref<16x32xbf16, #tpu.memory_space<vmem>>, vector<16x32xbf16>
    %c0_7 = arith.constant 0 : index
    %c0_8 = arith.constant 0 : index
    %9 = vector.load %arg4[%c0_7, %c0_8] : memref<32x32xbf16, #tpu.memory_space<vmem>>, vector<32x32xbf16>
    %cst_9 = arith.constant dense<0.000000e+00> : vector<16x32xf32>
    %10 = tpu.matmul %8, %9, %cst_9 {dimension_numbers = #tpu.dot_dimension_numbers<[1], [0], [0], [1], [0, 0, 1, 1], [], []>} : vector<16x32xbf16>, vector<32x32xbf16>, vector<16x32xf32> -> vector<16x32xf32>
    %c0_10 = arith.constant 0 : index
    %c0_11 = arith.constant 0 : index
    %11 = vector.load %arg5[%c0_10, %c0_11] : memref<32x32xbf16, #tpu.memory_space<vmem>>, vector<32x32xbf16>
    %cst_12 = arith.constant dense<0.000000e+00> : vector<32x32xf32>
    %12 = tpu.matmul %7, %11, %cst_12 {dimension_numbers = #tpu.dot_dimension_numbers<[1], [0], [0], [1], [0, 0, 1, 1], [], []>} : vector<32x32xbf16>, vector<32x32xbf16>, vector<32x32xf32> -> vector<32x32xf32>
    %c0_13 = arith.constant 0 : index
    %c0_14 = arith.constant 0 : index
    %13 = vector.load %arg6[%c0_13, %c0_14] : memref<32x32xbf16, #tpu.memory_space<vmem>>, vector<32x32xbf16>
    %cst_15 = arith.constant dense<0.000000e+00> : vector<32x32xf32>
    %14 = tpu.matmul %7, %13, %cst_15 {dimension_numbers = #tpu.dot_dimension_numbers<[1], [0], [0], [1], [0, 0, 1, 1], [], []>} : vector<32x32xbf16>, vector<32x32xbf16>, vector<32x32xf32> -> vector<32x32xf32>
    %15 = arith.truncf %14 : vector<32x32xf32> to vector<32x32xbf16>
    %16 = vector.extract_strided_slice %10 {offsets = [0, 0], sizes = [8, 32], strides = [1, 1]} : vector<16x32xf32> to vector<8x32xf32>
    %17 = arith.truncf %16 : vector<8x32xf32> to vector<8x32xbf16>
    %18 = vector.extract_strided_slice %12 {offsets = [0, 0], sizes = [16, 32], strides = [1, 1]} : vector<32x32xf32> to vector<16x32xf32>
    %19 = arith.truncf %18 : vector<16x32xf32> to vector<16x32xbf16>
    %20 = vector.extract_strided_slice %15 {offsets = [0, 0], sizes = [16, 32], strides = [1, 1]} : vector<32x32xbf16> to vector<16x32xbf16>
    %cst_16 = arith.constant dense<0.000000e+00> : vector<8x16xf32>
    %21 = tpu.matmul %17, %19, %cst_16 {dimension_numbers = #tpu.dot_dimension_numbers<[1], [1], [0], [0], [0, 0, 1, 0], [], []>} : vector<8x32xbf16>, vector<16x32xbf16>, vector<8x16xf32> -> vector<8x16xf32>
    %cst_17 = arith.constant 0.176776692 : f32
    %22 = vector.broadcast %cst_17 : f32 to vector<8x16xf32>
    %23 = arith.mulf %21, %22 : vector<8x16xf32>
    %cst_18 = arith.constant dense<0xFF800000> : vector<8xf32>
    %24 = vector.multi_reduction <maximumf>, %23, %cst_18 [1] : vector<8x16xf32> to vector<8xf32>
    %25 = vector.shape_cast %24 : vector<8xf32> to vector<8x1xf32>
    %26 = vector.broadcast %25 : vector<8x1xf32> to vector<8x16xf32>
    %27 = arith.subf %23, %26 : vector<8x16xf32>
    %28 = math.exp %27 : vector<8x16xf32>
    %cst_19 = arith.constant dense<0.000000e+00> : vector<8xf32>
    %29 = vector.multi_reduction <add>, %28, %cst_19 [1] : vector<8x16xf32> to vector<8xf32>
    %30 = vector.shape_cast %29 : vector<8xf32> to vector<8x1xf32>
    %31 = tpu.reciprocal %30 {approx = true} : vector<8x1xf32> -> vector<8x1xf32>
    %32 = vector.broadcast %31 : vector<8x1xf32> to vector<8x16xf32>
    %33 = arith.mulf %28, %32 : vector<8x16xf32>
    %34 = arith.truncf %33 : vector<8x16xf32> to vector<8x16xbf16>
    %cst_20 = arith.constant dense<0.000000e+00> : vector<8x32xf32>
    %35 = tpu.matmul %34, %20, %cst_20 {dimension_numbers = #tpu.dot_dimension_numbers<[1], [0], [0], [1], [0, 0, 1, 1], [], []>} : vector<8x16xbf16>, vector<16x32xbf16>, vector<8x32xf32> -> vector<8x32xf32>
    %c0_21 = arith.constant 0 : index
    %c0_22 = arith.constant 0 : index
    %36 = vector.load %arg10[%c0_21, %c0_22] : memref<16x32xf32, #tpu.memory_space<vmem>>, vector<8x32xf32>
    tpu.vector_store %arg10[%c0_21, %c0_22], %35 {strides = array<i32>} : memref<16x32xf32, #tpu.memory_space<vmem>>, vector<8x32xf32>,
    %37 = vector.extract_strided_slice %10 {offsets = [8, 0], sizes = [8, 32], strides = [1, 1]} : vector<16x32xf32> to vector<8x32xf32>
    %38 = arith.truncf %37 : vector<8x32xf32> to vector<8x32xbf16>
    %39 = vector.extract_strided_slice %12 {offsets = [16, 0], sizes = [16, 32], strides = [1, 1]} : vector<32x32xf32> to vector<16x32xf32>
    %40 = arith.truncf %39 : vector<16x32xf32> to vector<16x32xbf16>
    %41 = vector.extract_strided_slice %15 {offsets = [16, 0], sizes = [16, 32], strides = [1, 1]} : vector<32x32xbf16> to vector<16x32xbf16>
    %cst_23 = arith.constant dense<0.000000e+00> : vector<8x16xf32>
    %42 = tpu.matmul %38, %40, %cst_23 {dimension_numbers = #tpu.dot_dimension_numbers<[1], [1], [0], [0], [0, 0, 1, 0], [], []>} : vector<8x32xbf16>, vector<16x32xbf16>, vector<8x16xf32> -> vector<8x16xf32>
    %cst_24 = arith.constant 0.176776692 : f32
    %43 = vector.broadcast %cst_24 : f32 to vector<8x16xf32>
    %44 = arith.mulf %42, %43 : vector<8x16xf32>
    %cst_25 = arith.constant dense<0xFF800000> : vector<8xf32>
    %45 = vector.multi_reduction <maximumf>, %44, %cst_25 [1] : vector<8x16xf32> to vector<8xf32>
    %46 = vector.shape_cast %45 : vector<8xf32> to vector<8x1xf32>
    %47 = vector.broadcast %46 : vector<8x1xf32> to vector<8x16xf32>
    %48 = arith.subf %44, %47 : vector<8x16xf32>
    %49 = math.exp %48 : vector<8x16xf32>
    %cst_26 = arith.constant dense<0.000000e+00> : vector<8xf32>
    %50 = vector.multi_reduction <add>, %49, %cst_26 [1] : vector<8x16xf32> to vector<8xf32>
    %51 = vector.shape_cast %50 : vector<8xf32> to vector<8x1xf32>
    %52 = tpu.reciprocal %51 {approx = true} : vector<8x1xf32> -> vector<8x1xf32>
    %53 = vector.broadcast %52 : vector<8x1xf32> to vector<8x16xf32>
    %54 = arith.mulf %49, %53 : vector<8x16xf32>
    %55 = arith.truncf %54 : vector<8x16xf32> to vector<8x16xbf16>
    %cst_27 = arith.constant dense<0.000000e+00> : vector<8x32xf32>
    %56 = tpu.matmul %55, %41, %cst_27 {dimension_numbers = #tpu.dot_dimension_numbers<[1], [0], [0], [1], [0, 0, 1, 1], [], []>} : vector<8x16xbf16>, vector<16x32xbf16>, vector<8x32xf32> -> vector<8x32xf32>
    %c8 = arith.constant 8 : index
    %c0_28 = arith.constant 0 : index
    %57 = vector.load %arg10[%c8, %c0_28] : memref<16x32xf32, #tpu.memory_space<vmem>>, vector<8x32xf32>
    tpu.vector_store %arg10[%c8, %c0_28], %56 {strides = array<i32>} : memref<16x32xf32, #tpu.memory_space<vmem>>, vector<8x32xf32>,
    %c0_29 = arith.constant 0 : index
    %c0_30 = arith.constant 0 : index
    %58 = vector.load %arg10[%c0_29, %c0_30] : memref<16x32xf32, #tpu.memory_space<vmem>>, vector<16x32xf32>
    %59 = arith.extf %8 : vector<16x32xbf16> to vector<16x32xf32>
    %60 = arith.addf %58, %59 : vector<16x32xf32>
    %61 = math.tanh %60 : vector<16x32xf32>
    %62 = arith.truncf %61 : vector<16x32xf32> to vector<16x32xbf16>
    %c0_31 = arith.constant 0 : index
    %c0_32 = arith.constant 0 : index
    %63 = vector.load %arg7[%c0_31, %c0_32] : memref<32x128xbf16, #tpu.memory_space<vmem>>, vector<32x128xbf16>
    %cst_33 = arith.constant dense<0.000000e+00> : vector<16x128xf32>
    %64 = tpu.matmul %62, %63, %cst_33 {dimension_numbers = #tpu.dot_dimension_numbers<[1], [0], [0], [1], [0, 0, 1, 1], [], []>} : vector<16x32xbf16>, vector<32x128xbf16>, vector<16x128xf32> -> vector<16x128xf32>
    %c0_34 = arith.constant 0 : index
    %c0_35 = arith.constant 0 : index
    %65 = vector.load %arg8[%c0_34, %c0_35] : memref<1x128xf32, #tpu.memory_space<vmem>>, vector<1x128xf32>
    %66 = vector.broadcast %65 : vector<1x128xf32> to vector<16x128xf32>
    %67 = arith.addf %64, %66 : vector<16x128xf32>
    %c0_36 = arith.constant 0 : index
    %c0_37 = arith.constant 0 : index
    %68 = vector.load %arg9[%c0_36, %c0_37] : memref<16x128xf32, #tpu.memory_space<vmem>>, vector<16x128xf32>
    tpu.vector_store %arg9[%c0_36, %c0_37], %67 {strides = array<i32>} : memref<16x128xf32, #tpu.memory_space<vmem>>, vector<16x128xf32>,
    return
  }
}

</mosaic_0001>

<bundles_post_ra>
// kernel: tpu_custom_call.1
= control target key start
LH: loop header
LB: loop body
LE: loop exit
PB: predicated region body
PF: predicated region fallthrough
CT: control target
= control target key end

     0   :  { %14 = vsyncpa [#allocation4], 0  ;;  %s1300_s0 = inlined_call_operand.hbm [shape: bf16[32,32], index: 0, kind: input, shape index: {}]   ;;  %s1301_s1 = inlined_call_operand.hbm [shape: bf16[16,32], index: 1, kind: input, shape index: {}]   ;;  %s1302_s2 = inlined_call_operand.hbm [shape: bf16[32,32], index: 2, kind: input, shape index: {}]   ;;  %s1303_s3 = inlined_call_operand.vmem [shape: f32[1,32], index: 3, kind: input, shape index: {}]   ;;  %s1304_s4 = inlined_call_operand.hbm [shape: bf16[32,32], index: 4, kind: input, shape index: {}]   ;;  %s1305_s5 = inlined_call_operand.vmem [shape: bf16[32,32], index: 5, kind: input, shape index: {}]   ;;  %s1306_s6 = inlined_call_operand.hbm [shape: bf16[32,32], index: 6, kind: input, shape index: {}]   ;;  %s1307_s7 = inlined_call_operand.hbm [shape: bf16[32,128], index: 7, kind: input, shape index: {}]   ;;  %s1308_s8 = inlined_call_operand.vmem [shape: f32[1,128], index: 8, kind: input, shape index: {}]   ;;  %s1309_s9 = inlined_call_operand.hbm [shape: f32[16,128], index: 9, kind: output, shape index: {}]  }
   0x1   :  { %15 = vsyncpa [#allocation7], 0 }
   0x2   :  { %16 = vsyncpa [#allocation10], 0 }
   0x3   :  { %17 = vsyncpa [#allocation13], 0 }
   0x4   :  { %18 = vsyncpa [#allocation5], 0  ;;  %s1057_s30 = smov [#allocation6]   ;;  %s1058_s11 = smov [#allocation9]  }
   0x5   :  { %s36_s10 = sshll.u32 %s1057_s30, 4  ;;  %s62_s12 = sshll.u32 %s1058_s11, 4  ;;  %s37_s10 = int_to_ptr.vmem [resolvable:$true] %s36_s10  ;;  %s1120_s12 = int_to_ptr.vmem [resolvable:$true] %s62_s12 }
   0x6   :  { %s893_s15 = scalar_lea.hbm %s1301_s1, 128 }
   0x7   :  { %p894_p0 = scmp.ne.s32.totalorder %s1301_s1, %s893_s15  ;;  %p897_p1 = scmp.lt.u32.totalorder %s893_s15, %s1301_s1 }
   0x9   :  { %p899_p2 = pnand %p897_p1, %p894_p0 }
   0xb   :  { %902 = shalt.err (!%p899_p2)
}
   0xc   :  { %s903_s20 = scalar_lea.vmem %s37_s10, 128  ;;  %p908_p4 = scmp.lt.s32.totalorder %s37_s10, %s37_s10 }
   0xd   :  { %p904_p3 = scmp.ne.s32.totalorder %s37_s10, %s903_s20  ;;  %p909_p5 = scmp.lt.s32.totalorder %s903_s20, %s903_s20 }
   0xf   :  { %p910_p6 = por %p909_p5, %p908_p4 }
  0x11   :  { %p911_p7 = pnand %p910_p6, %p904_p3 }
  0x13   :  { %914 = shalt.err (!%p911_p7)
}
  0x14   :  { %s1059_s21 = smov 64   ;;  %s1060_s22 = smov 4  }
  0x15   :  { %42 = dma.hbm_to_vmem [thread:$0]  %s1301_s1, 128, %s37_s10, [#allocation7], %s1059_s21, %s1059_s21, %s1060_s22  }
  0x16   :  { %s915_s27 = scalar_lea.hbm %s1304_s4, 256 }
  0x17   :  { %p916_p8 = scmp.ne.s32.totalorder %s1304_s4, %s915_s27  ;;  %p919_p9 = scmp.lt.u32.totalorder %s915_s27, %s1304_s4 }
  0x19   :  { %p921_p10 = pnand %p919_p9, %p916_p8 }
  0x1b   :  { %924 = shalt.err (!%p921_p10)
}
  0x1c   :  { %s925_s13 = scalar_lea.vmem %s1120_s12, 256  ;;  %p930_p12 = scmp.lt.s32.totalorder %s1120_s12, %s1120_s12 }
  0x1d   :  { %p926_p11 = scmp.ne.s32.totalorder %s1120_s12, %s925_s13  ;;  %p931_p13 = scmp.lt.s32.totalorder %s925_s13, %s925_s13 }
  0x1f   :  { %p932_p0 = por %p931_p13, %p930_p12 }
  0x21   :  { %p933_p1 = pnand %p932_p0, %p926_p11 }
  0x23   :  { %936 = shalt.err (!%p933_p1)
}
  0x24   :  { %68 = dma.hbm_to_vmem [thread:$0]  %s1304_s4, 256, %s1120_s12, [#allocation10], %s1059_s21, %s1059_s21, %s1060_s22  }
  0x25   :  { %s1061_s14 = smov [#allocation3]   ;;  %s1062_s16 = smov [#allocation8]  }
  0x26   :  { %s24_s15 = sshll.u32 %s1061_s14, 4  ;;  %s48_s17 = sshll.u32 %s1062_s16, 4  ;;  %s25_s15 = int_to_ptr.vmem [resolvable:$true] %s24_s15  ;;  %s1157_s17 = int_to_ptr.vmem [resolvable:$true] %s48_s17 }
  0x27   :  { %s937_s20 = scalar_lea.hbm %s1300_s0, 256 }
  0x28   :  { %p938_p2 = scmp.ne.s32.totalorder %s1300_s0, %s937_s20  ;;  %p941_p3 = scmp.lt.u32.totalorder %s937_s20, %s1300_s0 }
  0x2a   :  { %p943_p4 = pnand %p941_p3, %p938_p2 }
  0x2c   :  { %946 = shalt.err (!%p943_p4)
}
  0x2d   :  { %s947_s4 = scalar_lea.vmem %s25_s15, 256  ;;  %p952_p6 = scmp.lt.s32.totalorder %s25_s15, %s25_s15 }
  0x2e   :  { %p948_p5 = scmp.ne.s32.totalorder %s25_s15, %s947_s4  ;;  %p953_p7 = scmp.lt.s32.totalorder %s947_s4, %s947_s4 }
  0x30   :  { %p954_p8 = por %p953_p7, %p952_p6 }
  0x32   :  { %p955_p9 = pnand %p954_p8, %p948_p5 }
  0x34   :  { %958 = shalt.err (!%p955_p9)
}
  0x35   :  { %30 = dma.hbm_to_vmem [thread:$0]  %s1300_s0, 256, %s25_s15, [#allocation4], %s1059_s21, %s1059_s21, %s1060_s22  }
  0x36   :  { %s959_s30 = scalar_lea.hbm %s1302_s2, 256 }
  0x37   :  { %p960_p10 = scmp.ne.s32.totalorder %s1302_s2, %s959_s30  ;;  %p963_p11 = scmp.lt.u32.totalorder %s959_s30, %s1302_s2 }
  0x39   :  { %p965_p12 = pnand %p963_p11, %p960_p10 }
  0x3b   :  { %968 = shalt.err (!%p965_p12)
}
  0x3c   :  { %s969_s14 = scalar_lea.vmem %s1157_s17, 256  ;;  %p974_p0 = scmp.lt.s32.totalorder %s1157_s17, %s1157_s17 }
  0x3d   :  { %p970_p13 = scmp.ne.s32.totalorder %s1157_s17, %s969_s14  ;;  %p975_p1 = scmp.lt.s32.totalorder %s969_s14, %s969_s14 }
  0x3f   :  { %p976_p2 = por %p975_p1, %p974_p0 }
  0x41   :  { %p977_p3 = pnand %p976_p2, %p970_p13 }
  0x43   :  { %980 = shalt.err (!%p977_p3)
}
  0x44   :  { %54 = dma.hbm_to_vmem [thread:$0]  %s1302_s2, 256, %s1157_s17, [#allocation7], %s1059_s21, %s1059_s21, %s1060_s22  }
  0x45   :  { %s1063_s16 = smov [#allocation11]   ;;  %s1064_s19 = smov [#allocation12]  }
  0x46   :  { %s76_s18 = sshll.u32 %s1063_s16, 4  ;;  %s88_s20 = sshll.u32 %s1064_s19, 4  ;;  %s77_s18 = int_to_ptr.vmem [resolvable:$true] %s76_s18  ;;  %s1194_s20 = int_to_ptr.vmem [resolvable:$true] %s88_s20 }
  0x47   :  { %s981_s25 = scalar_lea.hbm %s1306_s6, 256 }
  0x48   :  { %p982_p4 = scmp.ne.s32.totalorder %s1306_s6, %s981_s25  ;;  %p985_p5 = scmp.lt.u32.totalorder %s981_s25, %s1306_s6 }
  0x4a   :  { %p987_p6 = pnand %p985_p5, %p982_p4 }
  0x4c   :  { %990 = shalt.err (!%p987_p6)
}
  0x4d   :  { %s991_s2 = scalar_lea.vmem %s77_s18, 256  ;;  %p996_p8 = scmp.lt.s32.totalorder %s77_s18, %s77_s18 }
  0x4e   :  { %p992_p7 = scmp.ne.s32.totalorder %s77_s18, %s991_s2  ;;  %p997_p9 = scmp.lt.s32.totalorder %s991_s2, %s991_s2 }
  0x50   :  { %p998_p10 = por %p997_p9, %p996_p8 }
  0x52   :  { %p999_p11 = pnand %p998_p10, %p992_p7 }
  0x54   :  { %1002 = shalt.err (!%p999_p11)
}
  0x55   :  { %82 = dma.hbm_to_vmem [thread:$0]  %s1306_s6, 256, %s77_s18, [#allocation10], %s1059_s21, %s1059_s21, %s1060_s22  }
  0x56   :  { %s1003_s11 = scalar_lea.hbm %s1307_s7, 256 }
  0x57   :  { %p1004_p12 = scmp.ne.s32.totalorder %s1307_s7, %s1003_s11  ;;  %p1007_p13 = scmp.lt.u32.totalorder %s1003_s11, %s1307_s7 }
  0x59   :  { %p1009_p0 = pnand %p1007_p13, %p1004_p12 }
  0x5b   :  { %1012 = shalt.err (!%p1009_p0)
}
  0x5c   :  { %s1013_s0 = scalar_lea.vmem %s1194_s20, 256  ;;  %p1018_p2 = scmp.lt.s32.totalorder %s1194_s20, %s1194_s20 }
  0x5d   :  { %p1014_p1 = scmp.ne.s32.totalorder %s1194_s20, %s1013_s0  ;;  %p1019_p3 = scmp.lt.s32.totalorder %s1013_s0, %s1013_s0 }
  0x5f   :  { %p1020_p4 = por %p1019_p3, %p1018_p2 }
  0x61   :  { %p1021_p5 = pnand %p1020_p4, %p1014_p1 }
  0x63   :  { %1024 = shalt.err (!%p1021_p5)
}
  0x64   :  { %94 = dma.hbm_to_vmem [thread:$0]  %s1307_s7, 256, %s1194_s20, [#allocation13], %s1059_s21, %s1059_s21, %s1060_s22  }
  0x65   :  { %1047 = dma.done.wait [#allocation4], 256  }
  0x66   :  { %1048 = vsyncadd [#allocation4], 4294967040 }
  0x67   :  { %1049 = dma.done.wait [#allocation7], 384  }
  0x68   :  { %1050 = vsyncadd [#allocation7], 4294966912 }
  0x69   :  { %1051 = dma.done.wait [#allocation10], 512  }
  0x6a   :  { %1052 = vsyncadd [#allocation10], 4294966784 }
  0x6b   :  { %1053 = dma.done.wait [#allocation13], 256  }
  0x6c   :  { %1054 = vsyncadd [#allocation13], 4294967040  ;;  %v859_v0 = vld [vmem:[#allocation8] sm:$0xff]   ;;  %v860_v1 = vld [vmem:[#allocation8 + $0x8] sm:$0xff]   ;;  %vm153_vm0 = vcmask 261120   ;;  %v1065_v5 = vmov 0.0  }
  0x6d   :  { %782 = vmatprep.subr.bf16.mxu0 %v859_v0  ;;  %v861_v2 = vld [vmem:[#allocation3] sm:$0xff]   ;;  %v862_v3 = vld [vmem:[#allocation3 + $0x8] sm:$0xff]   ;;  %790 = vmatprep.subr.bf16.mxu1 %v1065_v5  ;;  %v864_v6 = vld [vmem:[#allocation9 + $0x8] sm:$0xff]   ;;  %vm1066_vm1 = vmmov 0   ;;  %vm469_vm2 = vcmask 130048   ;;  %s1067_s20 = smov [#allocation14]  }
  0x6e   :  { %783 = vmatpush3.bf16.msra.mxu0 %v859_v0  ;;  %786 = vmatprep.mubr.msk.bf16.mxu0 %vm153_vm0, %v861_v2  ;;  %v863_v4 = vld [vmem:[#allocation9] sm:$0xff]   ;;  %v1235_v7 = vld [vmem:[#allocation6] sm:$0xff]   ;;  %v867_v9 = vld [vmem:[#allocation11] sm:$0xff]   ;;  %s714_s23 = sshll.u32 %s1067_s20, 4  ;;  %s715_s23 = int_to_ptr.vmem [resolvable:$true] %s714_s23 }
  0x6f   :  { %784 = vmatprep.subr.bf16.mxu0 %v860_v1  ;;  %791 = vmatpush3.bf16.msra.mxu1 %v863_v4  ;;  %v866_v8 = vld [vmem:[%s1305_s5] sm:$0xff]   ;;  %v868_v10 = vld [vmem:[%s1305_s5 + $0x8] sm:$0xff]   ;;  %v869_v11 = vld [vmem:[#allocation11 + $0x8] sm:$0xff]   ;;  %s1025_s24 = scalar_lea.vmem %s715_s23, 256  ;;  %p1030_p7 = scmp.lt.s32.totalorder %s715_s23, %s715_s23 }
  0x70   :  { %792 = vmatprep.subr.bf16.mxu1 %v1065_v5  ;;  %794 = vmatprep.mubr.msk.bf16.mxu1 %vm1066_vm1, %v1065_v5  ;;  %v729_v12 = vld [vmem:[%s1303_s3] ss:$0 sm:$0xff]  ;;  %p1026_p6 = scmp.ne.s32.totalorder %s715_s23, %s1025_s24  ;;  %p1031_p8 = scmp.lt.s32.totalorder %s1025_s24, %s1025_s24 }
  0x72   :  { %785 = vmatpush3.bf16.msra.mxu0 %v860_v1  ;;  %p1032_p9 = por %p1031_p8, %p1030_p7 }
  0x73   :  { %798 = vmatprep.subr.bf16.mxu0 %v866_v8  ;;  %793 = vmatpush3.bf16.msra.mxu1 %v864_v6 }
  0x74   :  { %806 = vmatprep.subr.bf16.mxu1 %v867_v9  ;;  %p1033_p10 = pnand %p1032_p9, %p1026_p6 }
  0x75   :  { %787 = vmatmul.mubr.msk.bf16.vlgmr.msra.gmra.mrb[0].mxu0 %vm153_vm0, %v862_v3 }
  0x76   :  { %799 = vmatpush3.bf16.msra.mxu0 %v866_v8  ;;  %795 = vmatmul.mubr.msk.bf16.vlgmr.msra.gmra.mrb[0].mxu1 %vm153_vm0, %v1235_v7 }
  0x77   :  { %800 = vmatprep.subr.bf16.mxu0 %v868_v10  ;;  %807 = vmatpush3.bf16.msra.mxu1 %v867_v9 }
  0x78   :  { %808 = vmatprep.subr.bf16.mxu1 %v869_v11 }
  0x7a   :  { %801 = vmatpush3.bf16.msra.mxu0 %v868_v10 }
  0x7b   :  { %814 = vmatprep.subr.bf16.mxu0 %v1065_v5  ;;  %809 = vmatpush3.bf16.msra.mxu1 %v869_v11 }
  0x7c   :  { %820 = vmatprep.subr.bf16.mxu1 %v1065_v5 }
 0x148   :  { %v788_v13 = vpop.f32.mrb[0].mxu0 }
 0x149   :  { %v203_v14 = vadd.f32 %v788_v13, %v729_v12  ;;  %v194_v15 = vpop.f32.mrb[1].mxu0  ;;  %v275_v27 = vpop.f32.mrb[0].mxu1 }
 0x14a   :  { %v195_v16 = vadd.f32 %v729_v12, %v194_v15  ;;  %v789_v17 = vpop.f32.mrb[2].mxu0  ;;  %v796_v28 = vpop.f32.mrb[1].mxu1  ;;  %v420_v44 = vpack.c.bf16 %v275_v27, %v275_v27  ;;  %v870_v15 = vld [vmem:[#allocation12] sm:$0xff]   ;;  %v634_v27 = vunpack.c.h.bf16 %v1235_v7 }
 0x14b   :  { %873 = vtanh.f32 %v203_v14  ;;  %v206_v18 = vadd.f32 %v789_v17, %v729_v12  ;;  %v197_v19 = vpop.f32.mrb[3].mxu0  ;;  %v278_v29 = vpop.f32.mrb[2].mxu1 }
 0x14c   :  { %875 = vtanh.f32 %v195_v16  ;;  %v198_v20 = vadd.f32 %v729_v12, %v197_v19  ;;  %v797_v30 = vpop.f32.mrb[3].mxu1  ;;  %v526_v46 = vpack.c.bf16 %v278_v29, %v278_v29  ;;  %v871_v16 = vld [vmem:[#allocation12 + $0x8] sm:$0xff]  }
 0x14d   :  { %877 = vtanh.f32 %v206_v18 }
 0x14e   :  { %879 = vtanh.f32 %v198_v20 }
 0x155   :  { %v874_v21 = vpop.eup %873 }
 0x156   :  { %v876_v22 = vpop.eup %875 }
 0x157   :  { %v878_v23 = vpop.eup %877 }
 0x158   :  { %v880_v24 = vpop.eup %879  ;;  %v214_v25 = vpack.c.bf16 %v878_v23, %v874_v21  ;;  %v633_v23 = vunpack.c.l.bf16 %v1235_v7 }
 0x159   :  { %v213_v26 = vpack.c.bf16 %v880_v24, %v876_v22 }
 0x15b   :  { %802 = vmatprep.mubr.msk.bf16.mxu0 %vm153_vm0, %v213_v26  ;;  %810 = vmatprep.mubr.msk.bf16.mxu1 %vm153_vm0, %v213_v26 }
 0x15c   :  { %803 = vmatmul.mubr.msk.bf16.vlgmr.msra.gmra.mrb[4].mxu0 %vm153_vm0, %v214_v25  ;;  %811 = vmatmul.mubr.msk.bf16.vlgmr.msra.gmra.mrb[4].mxu1 %vm153_vm0, %v214_v25 }
 0x15d   :  { %816 = vmatprep.mubr.msk.bf16.mxu0 %vm1066_vm1, %v1065_v5  ;;  %822 = vmatprep.mubr.msk.bf16.mxu1 %vm1066_vm1, %v1065_v5 }
 0x22f   :  { %v804_v31 = vpop.f32.mrb[4].mxu0  ;;  %v812_v32 = vpop.f32.mrb[4].mxu1 }
 0x230   :  { %v338_v33 = vpop.f32.mrb[5].mxu0  ;;  %v403_v34 = vpop.f32.mrb[5].mxu1 }
 0x231   :  { %v805_v35 = vpop.f32.mrb[6].mxu0  ;;  %v813_v36 = vpop.f32.mrb[6].mxu1 }
 0x232   :  { %v527_v37 = vpack.c.bf16 %v805_v35, %v804_v31  ;;  %v419_v38 = vpack.c.bf16 %v813_v36, %v812_v32  ;;  %v341_v39 = vpop.f32.mrb[7].mxu0  ;;  %v406_v40 = vpop.f32.mrb[7].mxu1 }
 0x233   :  { %v421_v41 = vpack.c.bf16 %v341_v39, %v338_v33  ;;  %v418_v42 = vpack.c.bf16 %v406_v40, %v403_v34  ;;  %v752_v33 = vld [vmem:[%s1308_s8] ss:$0 sm:$0xff] }
 0x234   :  { %v532_v45 = vsel %vm153_vm0, %v527_v37, 0 }
 0x235   :  { %v426_v43 = vsel %vm153_vm0, %v421_v41, 0  ;;  %821 = vmatpush3.bf16.msra.mxu1 %v418_v42 }
 0x236   :  { %815 = vmatpush3.bf16.xpose.msra.mxu0 %v426_v43  ;;  %832 = vmatprep.subr.bf16.mxu1 %v1065_v5 }
 0x237   :  { %826 = vmatprep.subr.bf16.mxu0 %v1065_v5 }
 0x23d   :  { %817 = vmatmul.mubr.msk.bf16.vlgmr.msra.gmra.mrb[8].mxu0 %vm153_vm0, %v420_v44 }
 0x23e   :  { %827 = vmatpush3.bf16.xpose.msra.mxu0 %v532_v45  ;;  %828 = vmatprep.mubr.msk.bf16.mxu0 %vm1066_vm1, %v1065_v5 }
 0x23f   :  { %838 = vmatprep.subr.bf16.mxu0 %v1065_v5 }
 0x245   :  { %829 = vmatmul.mubr.msk.bf16.vlgmr.msra.gmra.mrb[12].mxu0 %vm153_vm0, %v526_v46 }
 0x246   :  { %842 = vmatprep.mubr.msk.bf16.mxu0 %vm1066_vm1, %v1065_v5  ;;  %839 = vmatpush3.bf16.msra.mxu0 %v870_v15 }
 0x247   :  { %840 = vmatprep.subr.bf16.mxu0 %v1065_v5 }
 0x24a   :  { %841 = vmatpush3.bf16.msra.mxu0 %v871_v16 }
 0x310   :  { %v462_v47 = vpop.f32.mrb[8].mxu0 }
 0x311   :  { %v468_v48 = vmul.f32 0.17677669, %v462_v47  ;;  %v818_v49 = vpop.f32.mrb[9].mxu0 }
 0x312   :  { %v465_v50 = vpop.f32.mrb[10].mxu0 }
 0x313   :  { %v819_v51 = vpop.f32.mrb[11].mxu0  ;;  %v470_v52 = vsel %vm469_vm2, %v468_v48, -inf }
 0x314   :  { %471 = vmax.xlane.f32.xlu0 %v470_v52 }
 0x318   :  { %v568_v53 = vpop.f32.mrb[12].mxu0 }
 0x319   :  { %v574_v54 = vmul.f32 0.17677669, %v568_v53  ;;  %v830_v55 = vpop.f32.mrb[13].mxu0 }
 0x31a   :  { %v571_v56 = vpop.f32.mrb[14].mxu0 }
 0x31b   :  { %v831_v57 = vpop.f32.mrb[15].mxu0  ;;  %v575_v58 = vsel %vm469_vm2, %v574_v54, -inf }
 0x31c   :  { %576 = vmax.xlane.f32.xlu0 %v575_v58 }
 0x3a1   :  { %v472_v59 = vpop.xlane.xlu0 %471 }
 0x3a2   :  { %v473_v60 = vsub.f32 %v468_v48, %v472_v59 }
 0x3a4   :  { %v474_v61 = vmul.f32 1.442695, %v473_v60 }
 0x3a6   :  { %881 = vpow2.f32 %v474_v61 }
 0x3a9   :  { %v577_v62 = vpop.xlane.xlu0 %576 }
 0x3aa   :  { %v578_v63 = vsub.f32 %v574_v54, %v577_v62 }
 0x3ac   :  { %v579_v0 = vmul.f32 1.442695, %v578_v63 }
 0x3ae   :  { %883 = vpow2.f32 %v579_v0 }
 0x3b0   :  { %v882_v1 = vpop.eup %881 }
 0x3b1   :  { %v476_v2 = vsel %vm469_vm2, %v882_v1, 0.0 }
 0x3b2   :  { %477 = vadd.xlane.f32.xlu1 %v476_v2 }
 0x3b8   :  { %v884_v3 = vpop.eup %883 }
 0x3b9   :  { %v581_v4 = vsel %vm469_vm2, %v884_v3, 0.0 }
 0x3ba   :  { %582 = vadd.xlane.f32.xlu1 %v581_v4 }
 0x43f   :  { %v478_v6 = vpop.xlane.xlu1 %477 }
 0x440   :  { %885 = vrcp.f32 %v478_v6 }
 0x447   :  { %v583_v8 = vpop.xlane.xlu1 %582 }
 0x448   :  { %887 = vrcp.f32 %v583_v8 }
 0x44a   :  { %v886_v9 = vpop.eup %885 }
 0x44b   :  { %v480_v10 = vmul.f32 %v886_v9, %v882_v1 }
 0x44d   :  { %v481_v11 = vpack.c.bf16 %v480_v10, %v480_v10 }
 0x44f   :  { %823 = vmatmul.mubr.msk.bf16.vlgmr.msra.gmra.mrb[8].mxu1 %vm469_vm2, %v481_v11 }
 0x450   :  { %833 = vmatpush3.bf16.msra.mxu1 %v419_v38  ;;  %834 = vmatprep.mubr.msk.bf16.mxu1 %vm1066_vm1, %v1065_v5 }
 0x452   :  { %v888_v12 = vpop.eup %887 }
 0x453   :  { %v585_v13 = vmul.f32 %v888_v12, %v884_v3 }
 0x455   :  { %v586_v14 = vpack.c.bf16 %v585_v13, %v585_v13 }
 0x457   :  { %835 = vmatmul.mubr.msk.bf16.vlgmr.msra.gmra.mrb[12].mxu1 %vm469_vm2, %v586_v14 }
 0x522   :  { %v519_v17 = vpop.f32.mrb[8].mxu1 }
 0x523   :  { %525 = vst.msk [vmem:[#allocation2] sm:$0xff] %vm153_vm0, %v519_v17  ;;  %v824_v18 = vpop.f32.mrb[9].mxu1 }
 0x524   :  { %v522_v19 = vpop.f32.mrb[10].mxu1 }
 0x525   :  { %v825_v20 = vpop.f32.mrb[11].mxu1 }
 0x52a   :  { %v624_v21 = vpop.f32.mrb[12].mxu1  ;;  %v631_v26 = vld [vmem:[#allocation2] sm:$0xff] }
 0x52b   :  { %630 = vst.msk [vmem:[#allocation2 + $0x8] sm:$0xff] %vm153_vm0, %v624_v21  ;;  %v836_v22 = vpop.f32.mrb[13].mxu1  ;;  %v635_v28 = vadd.f32 %v633_v23, %v631_v26 }
 0x52c   :  { %v627_v24 = vpop.f32.mrb[14].mxu1 }
 0x52d   :  { %v837_v25 = vpop.f32.mrb[15].mxu1  ;;  %889 = vtanh.f32 %v635_v28 }
 0x532   :  { %v632_v5 = vld [vmem:[#allocation2 + $0x8] sm:$0xff] }
 0x533   :  { %v636_v29 = vadd.f32 %v634_v27, %v632_v5 }
 0x535   :  { %891 = vtanh.f32 %v636_v29 }
 0x537   :  { %v890_v30 = vpop.eup %889 }
 0x53f   :  { %v892_v31 = vpop.eup %891 }
 0x540   :  { %v639_v32 = vpack.c.bf16 %v892_v31, %v890_v30 }
 0x542   :  { %843 = vmatmul.mubr.msk.bf16.vlgmr.msra.gmra.mrb[16].mxu0 %vm153_vm0, %v639_v32 }
 0x615   :  { %v700_v34 = vpop.f32.mrb[16].mxu0 }
 0x616   :  { %v701_v35 = vadd.f32 %v752_v33, %v700_v34  ;;  %v844_v36 = vpop.f32.mrb[17].mxu0 }
 0x617   :  { %v703_v7 = vpop.f32.mrb[18].mxu0 }
 0x618   :  { %707 = vst [vmem:[#allocation14] sm:$0xff] %v701_v35  ;;  %v704_v37 = vadd.f32 %v752_v33, %v703_v7  ;;  %v845_v38 = vpop.f32.mrb[19].mxu0 }
 0x61a   :  { %708 = vst [vmem:[#allocation14 + $0x8] sm:$0xff] %v704_v37 }
 0x61b   :  { %1036 = shalt.err (!%p1033_p10)
}
 0x61c   :  { %s1037_s26 = scalar_lea.hbm %s1309_s9, 256 }
 0x61d   :  { %p1038_p11 = scmp.ne.s32.totalorder %s1309_s9, %s1037_s26  ;;  %p1041_p12 = scmp.lt.u32.totalorder %s1037_s26, %s1309_s9 }
 0x61f   :  { %p1043_p13 = pnand %p1041_p12, %p1038_p11 }
 0x621   :  { %1046 = shalt.err (!%p1043_p13)
}
 0x622   :  { %s1068_s17 = smov 128   ;;  %s1069_s28 = smov 8  }
 0x623   :  { %720 = dma.vmem_to_hbm [thread:$0]  %s715_s23, 256, %s1309_s9, [#allocation5], %s1068_s17, %s1068_s17, %s1069_s28  }
 0x624   :  { %1055 = dma.done.wait [#allocation5], 256  }
 0x625   :  { %1056 = vsyncadd [#allocation5], 4294967040 }
 0x626   :  { %724 = vsyncpa [#allocation4], 1 }
 0x627   :  { %725 = vsyncpa [#allocation7], 1 }
 0x628   :  { %726 = vsyncpa [#allocation10], 1 }
 0x629   :  { %727 = vsyncpa [#allocation13], 1 }
 0x62a   :  { %728 = vsyncpa [#allocation5], 1 }

</bundles_post_ra>
